<compile_context>
chip_gen: v7x
topology: tpu7x:2x2x1
jax: 0.10.0
libtpu: 0.0.40
codegen_flags: <defaults>
</compile_context>

<pallas_src>
import functools

import jax
import jax.numpy as jnp
import numpy as np
from jax.experimental import pallas as pl
from jax.experimental.pallas import tpu as pltpu


# ----------------------------------------------------------------------------- kernel

def _sep_causal_conv_kernel(x_ref, h_ref, dw_ref, wf_ref, bf_ref, o_ref, win_ref,
                            *, K, dil, pad):
    """One (batch, time-tile) step.

    x_ref  : (1, C_in, TL)      current time tile (lane-dense)
    h_ref  : (1, 1, C_in, pad)  causal halo = last `pad` cols of the previous tile
    dw_ref : (C_in, K)          depthwise taps, channels on sublanes
    wf_ref : (C_out, C_in)      pointwise weights with BN scale folded in
    bf_ref : (C_out, 1)         depthwise-bias + pointwise-bias + BN shift, folded
    o_ref  : (1, C_out, TL)
    win_ref: (C_in, pad + TL)   per-tile VMEM window scratch
    """
    cur = x_ref[0]                                   # (C_in, TL)
    TL = cur.shape[-1]

    # Assemble the causally padded window for this tile (halo comes precomputed,
    # so there is no in-kernel zeroing and no L-sized scratch).
    if pad > 0:
        win_ref[:, :pad] = h_ref[0, 0]
    win_ref[:, pad:] = cur

    # Depthwise causal conv: y[c, t] = sum_k dw[c, k] * win[c, t + k*dil].
    # K static-offset slices + multiply-add, accumulated in f32.
    dw = dw_ref[...].astype(jnp.float32)             # (C_in, K)
    y = win_ref[:, 0:TL].astype(jnp.float32) * dw[:, 0:1]
    for k in range(1, K):
        off = k * dil                                # static slice offset
        y = y + win_ref[:, off:off + TL].astype(jnp.float32) * dw[:, k:k + 1]

    # Pointwise 1x1 conv + folded biases + folded (eval-mode) BatchNorm on the MXU.
    z = jnp.dot(wf_ref[...], y.astype(wf_ref.dtype),
                preferred_element_type=jnp.float32) + bf_ref[...]

    # Activation (default activation_fn = nn.ReLU).
    o_ref[0] = jnp.maximum(z, 0.0).astype(o_ref.dtype)


# ----------------------------------------------------------------------------- wrapper

def _pick_time_tile(L, max_tile=2048):
    """Largest multiple of 128 that divides L (capped); falls back to L itself."""
    best = 0
    t = 128
    while t <= min(L, max_tile):
        if L % t == 0:
            best = t
        t += 128
    return best if best > 0 else L


def separable_causal_conv1d_forward(x_ncl, dw, w_fold, b_fold, *,
                                    kernel_size, dilation,
                                    time_tile=None,
                                    compute_dtype=jnp.float32):
    """x_ncl: (N, C_in, L), PyTorch NCL layout. Returns (N, C_out, L) in compute_dtype."""
    N, C_in, L = x_ncl.shape
    C_out = w_fold.shape[0]
    pad = dilation * (kernel_size - 1)

    if time_tile is None:
        time_tile = _pick_time_tile(L)
    tl = int(time_tile)
    if L % tl != 0:
        raise ValueError(f"L={L} must be a multiple of the time tile {tl}")
    nt = L // tl

    x = x_ncl.astype(compute_dtype)
    dw_c = dw.astype(compute_dtype)
    wf_c = w_fold.astype(compute_dtype)
    bf_c = b_fold.astype(jnp.float32)

    # Per-tile causal halo: halo[b, j] = x[b, :, j*tl - pad : j*tl] (zeros for j=0).
    hw = max(pad, 1)
    if pad > 0:
        hp = jnp.pad(x, ((0, 0), (0, 0), (pad, 0)))[:, :, :L]        # shifted-right copy
        halo = hp.reshape(N, C_in, nt, tl)[:, :, :, :pad]            # (N, C_in, nt, pad)
        halo = jnp.transpose(halo, (0, 2, 1, 3))                     # (N, nt, C_in, pad)
    else:
        halo = jnp.zeros((N, nt, C_in, hw), compute_dtype)           # unused when pad == 0

    kernel = functools.partial(_sep_causal_conv_kernel,
                               K=kernel_size, dil=dilation, pad=pad)

    itemsize = jnp.dtype(compute_dtype).itemsize
    flops = 2.0 * N * L * (C_out * C_in + C_in * kernel_size)
    bytes_accessed = int((N * C_in * L + N * C_out * L + N * nt * C_in * hw) * itemsize
                         + (C_in * kernel_size + C_out * C_in) * itemsize + C_out * 4)

    return pl.pallas_call(
        kernel,
        out_shape=jax.ShapeDtypeStruct((N, C_out, L), compute_dtype),
        grid=(N, nt),
        in_specs=[
            pl.BlockSpec((1, C_in, tl), lambda b, j: (b, 0, j)),         # input time tile
            pl.BlockSpec((1, 1, C_in, hw), lambda b, j: (b, j, 0, 0)),   # causal halo
            pl.BlockSpec((C_in, kernel_size), lambda b, j: (0, 0)),      # depthwise taps
            pl.BlockSpec((C_out, C_in), lambda b, j: (0, 0)),            # folded 1x1 weights
            pl.BlockSpec((C_out, 1), lambda b, j: (0, 0)),               # folded bias column
        ],
        out_specs=pl.BlockSpec((1, C_out, tl), lambda b, j: (b, 0, j)),
        scratch_shapes=[pltpu.VMEM((C_in, pad + tl), compute_dtype)],    # per-tile window
        compiler_params=pltpu.CompilerParams(
            dimension_semantics=("parallel", "parallel")),
        cost_estimate=pl.CostEstimate(flops=int(flops), transcendentals=0,
                                      bytes_accessed=bytes_accessed),
    )(x, halo, dw_c, wf_c, bf_c)


# ----------------------------------------------------------------------------- params

def init_params(key, c_in, c_out, kernel_size, eps=1e-3):
    """Raw (un-folded) parameters mirroring the PyTorch module (eval-mode BN)."""
    keys = jax.random.split(key, 8)
    dw = 0.3 * jax.random.normal(keys[0], (c_in, kernel_size), jnp.float32)  # Conv1d (C,1,K) squeezed
    b_dw = 0.1 * jax.random.normal(keys[1], (c_in,), jnp.float32)
    w_pw = 0.3 * jax.random.normal(keys[2], (c_out, c_in), jnp.float32)      # Conv1d (Cout,Cin,1) squeezed
    b_pw = 0.1 * jax.random.normal(keys[3], (c_out,), jnp.float32)
    gamma = jax.random.uniform(keys[4], (c_out,), jnp.float32, 0.5, 1.5)
    beta = 0.1 * jax.random.normal(keys[5], (c_out,), jnp.float32)
    mean = 0.1 * jax.random.normal(keys[6], (c_out,), jnp.float32)
    var = jax.random.uniform(keys[7], (c_out,), jnp.float32, 0.5, 1.5)
    return dict(dw=dw, b_dw=b_dw, w_pw=w_pw, b_pw=b_pw,
                gamma=gamma, beta=beta, mean=mean, var=var, eps=eps)


def fold_params(raw):
    """Fold BN (eval mode) + both conv biases into one weight matrix and one bias."""
    s = raw["gamma"] / jnp.sqrt(raw["var"] + raw["eps"])     # BN scale
    sh = raw["beta"] - raw["mean"] * s                       # BN shift
    w_fold = s[:, None] * raw["w_pw"]                        # (C_out, C_in)
    # depthwise bias pushed through the pointwise conv, then BN-folded with b_pw
    b_fold = s * (raw["w_pw"] @ raw["b_dw"] + raw["b_pw"]) + sh
    return raw["dw"], w_fold, b_fold[:, None]                # bias as (C_out, 1) column


# ----------------------------------------------------------------------------- pure-JAX reference

def _ref_forward(x_ncl, raw, kernel_size, dilation):
    N, C, L = x_ncl.shape
    pad = dilation * (kernel_size - 1)
    xp = jnp.pad(x_ncl.astype(jnp.float32), ((0, 0), (0, 0), (pad, 0)))
    y = jnp.zeros_like(x_ncl, dtype=jnp.float32)
    for k in range(kernel_size):
        y = y + xp[:, :, k * dilation:k * dilation + L] * raw["dw"][None, :, k:k + 1]
    y = y + raw["b_dw"][None, :, None]
    z = jnp.einsum('oc,ncl->nol', raw["w_pw"], y) + raw["b_pw"][None, :, None]
    s = raw["gamma"] / jnp.sqrt(raw["var"] + raw["eps"])
    z = z * s[None, :, None] + (raw["beta"] - raw["mean"] * s)[None, :, None]
    return jnp.maximum(z, 0.0)


# ----------------------------------------------------------------------------- main

if __name__ == "__main__":
    key = jax.random.PRNGKey(0)
    # Small-ish demo: L chosen as a multiple of 128 so the time-tiled, lane-dense
    # path (grid = (N, L//TL)) is actually exercised.
    N, C_in, C_out, L = 2, 24, 32, 256
    kernel_size, dilation = 5, 2          # causal padding = dilation*(K-1) = 8

    k_x, k_p = jax.random.split(key)
    x_ncl = jax.random.normal(k_x, (N, C_in, L), jnp.float32)   # PyTorch-style NCL input
    raw = init_params(k_p, C_in, C_out, kernel_size)
    dw, w_fold, b_fold = fold_params(raw)

    out = separable_causal_conv1d_forward(
        x_ncl, dw, w_fold, b_fold,
        kernel_size=kernel_size, dilation=dilation,
        time_tile=128,                      # 2 time tiles per batch element
        compute_dtype=jnp.float32)          # use jnp.bfloat16 on v6e/v7x for streaming
    out = jax.block_until_ready(out)

    ref = _ref_forward(x_ncl, raw, kernel_size, dilation)
    np.testing.assert_allclose(np.asarray(out), np.asarray(ref), rtol=1e-4, atol=1e-4)

    print("KERNEL_OK")
</pallas_src>

<mosaic_0001>
module attributes {stable_mosaic.version = 11 : i64} {
  func.func @_sep_causal_conv_kernel(%arg0: i32, %arg1: i32, %arg2: memref<1x24x128xf32, #tpu.memory_space<vmem>>, %arg3: memref<1x1x24x8xf32, #tpu.memory_space<vmem>>, %arg4: memref<24x5xf32, #tpu.memory_space<vmem>>, %arg5: memref<32x24xf32, #tpu.memory_space<vmem>>, %arg6: memref<32x1xf32, #tpu.memory_space<vmem>>, %arg7: memref<1x32x128xf32, #tpu.memory_space<vmem>>, %arg8: memref<24x136xf32, #tpu.memory_space<vmem>>) attributes {dimension_semantics = [#tpu.dimension_semantics<parallel>, #tpu.dimension_semantics<parallel>], iteration_bounds = array<i64: 2, 2>, scalar_prefetch = 0 : i64, scratch_operands = 1 : i64, tpu.core_type = #tpu.core_type<tc>, window_params = [{transform_indices = @transform_0, window_bounds = array<i64: 1, 24, 128>}, {transform_indices = @transform_1, window_bounds = array<i64: 1, 1, 24, 8>}, {pipeline_mode = #tpu.pipeline_mode<synchronous>, transform_indices = @transform_2, window_bounds = array<i64: 24, 5>}, {pipeline_mode = #tpu.pipeline_mode<synchronous>, transform_indices = @transform_3, window_bounds = array<i64: 32, 24>}, {pipeline_mode = #tpu.pipeline_mode<synchronous>, transform_indices = @transform_4, window_bounds = array<i64: 32, 1>}, {transform_indices = @transform_5, window_bounds = array<i64: 1, 32, 128>}]} {
    %c0 = arith.constant 0 : index
    %c0_0 = arith.constant 0 : index
    %c0_1 = arith.constant 0 : index
    %0 = vector.load %arg2[%c0, %c0_0, %c0_1] : memref<1x24x128xf32, #tpu.memory_space<vmem>>, vector<1x24x128xf32>
    %1 = vector.shape_cast %0 : vector<1x24x128xf32> to vector<24x128xf32>
    %c0_2 = arith.constant 0 : index
    %c0_3 = arith.constant 0 : index
    %c0_4 = arith.constant 0 : index
    %c0_5 = arith.constant 0 : index
    %2 = vector.load %arg3[%c0_2, %c0_3, %c0_4, %c0_5] : memref<1x1x24x8xf32, #tpu.memory_space<vmem>>, vector<1x1x24x8xf32>
    %3 = vector.shape_cast %2 : vector<1x1x24x8xf32> to vector<24x8xf32>
    %c0_6 = arith.constant 0 : index
    %c0_7 = arith.constant 0 : index
    %4 = vector.load %arg8[%c0_6, %c0_7] : memref<24x136xf32, #tpu.memory_space<vmem>>, vector<24x8xf32>
    tpu.vector_store %arg8[%c0_6, %c0_7], %3 {strides = array<i32>} : memref<24x136xf32, #tpu.memory_space<vmem>>, vector<24x8xf32>,
    %c0_8 = arith.constant 0 : index
    %c8 = arith.constant 8 : index
    %5 = vector.load %arg8[%c0_8, %c8] : memref<24x136xf32, #tpu.memory_space<vmem>>, vector<24x128xf32>
    tpu.vector_store %arg8[%c0_8, %c8], %1 {strides = array<i32>} : memref<24x136xf32, #tpu.memory_space<vmem>>, vector<24x128xf32>,
    %c0_9 = arith.constant 0 : index
    %c0_10 = arith.constant 0 : index
    %6 = vector.load %arg4[%c0_9, %c0_10] : memref<24x5xf32, #tpu.memory_space<vmem>>, vector<24x5xf32>
    %c0_11 = arith.constant 0 : index
    %c0_12 = arith.constant 0 : index
    %7 = vector.load %arg8[%c0_11, %c0_12] : memref<24x136xf32, #tpu.memory_space<vmem>>, vector<24x128xf32>
    %8 = vector.extract_strided_slice %6 {offsets = [0, 0], sizes = [24, 1], strides = [1, 1]} : vector<24x5xf32> to vector<24x1xf32>
    %9 = vector.broadcast %8 : vector<24x1xf32> to vector<24x128xf32>
    %10 = arith.mulf %7, %9 : vector<24x128xf32>
    %c0_13 = arith.constant 0 : index
    %c2 = arith.constant 2 : index
    %11 = vector.load %arg8[%c0_13, %c2] : memref<24x136xf32, #tpu.memory_space<vmem>>, vector<24x128xf32>
    %12 = vector.extract_strided_slice %6 {offsets = [0, 1], sizes = [24, 1], strides = [1, 1]} : vector<24x5xf32> to vector<24x1xf32>
    %13 = vector.broadcast %12 : vector<24x1xf32> to vector<24x128xf32>
    %14 = arith.mulf %11, %13 : vector<24x128xf32>
    %15 = arith.addf %10, %14 : vector<24x128xf32>
    %c0_14 = arith.constant 0 : index
    %c4 = arith.constant 4 : index
    %16 = vector.load %arg8[%c0_14, %c4] : memref<24x136xf32, #tpu.memory_space<vmem>>, vector<24x128xf32>
    %17 = vector.extract_strided_slice %6 {offsets = [0, 2], sizes = [24, 1], strides = [1, 1]} : vector<24x5xf32> to vector<24x1xf32>
    %18 = vector.broadcast %17 : vector<24x1xf32> to vector<24x128xf32>
    %19 = arith.mulf %16, %18 : vector<24x128xf32>
    %20 = arith.addf %15, %19 : vector<24x128xf32>
    %c0_15 = arith.constant 0 : index
    %c6 = arith.constant 6 : index
    %21 = vector.load %arg8[%c0_15, %c6] : memref<24x136xf32, #tpu.memory_space<vmem>>, vector<24x128xf32>
    %22 = vector.extract_strided_slice %6 {offsets = [0, 3], sizes = [24, 1], strides = [1, 1]} : vector<24x5xf32> to vector<24x1xf32>
    %23 = vector.broadcast %22 : vector<24x1xf32> to vector<24x128xf32>
    %24 = arith.mulf %21, %23 : vector<24x128xf32>
    %25 = arith.addf %20, %24 : vector<24x128xf32>
    %c0_16 = arith.constant 0 : index
    %c8_17 = arith.constant 8 : index
    %26 = vector.load %arg8[%c0_16, %c8_17] : memref<24x136xf32, #tpu.memory_space<vmem>>, vector<24x128xf32>
    %27 = vector.extract_strided_slice %6 {offsets = [0, 4], sizes = [24, 1], strides = [1, 1]} : vector<24x5xf32> to vector<24x1xf32>
    %28 = vector.broadcast %27 : vector<24x1xf32> to vector<24x128xf32>
    %29 = arith.mulf %26, %28 : vector<24x128xf32>
    %30 = arith.addf %25, %29 : vector<24x128xf32>
    %c0_18 = arith.constant 0 : index
    %c0_19 = arith.constant 0 : index
    %31 = vector.load %arg5[%c0_18, %c0_19] : memref<32x24xf32, #tpu.memory_space<vmem>>, vector<32x24xf32>
    %cst = arith.constant dense<0.000000e+00> : vector<32x128xf32>
    %32 = tpu.matmul %31, %30, %cst {dimension_numbers = #tpu.dot_dimension_numbers<[1], [0], [0], [1], [0, 0, 1, 1], [], []>} : vector<32x24xf32>, vector<24x128xf32>, vector<32x128xf32> -> vector<32x128xf32>
    %c0_20 = arith.constant 0 : index
    %c0_21 = arith.constant 0 : index
    %33 = vector.load %arg6[%c0_20, %c0_21] : memref<32x1xf32, #tpu.memory_space<vmem>>, vector<32x1xf32>
    %34 = vector.broadcast %33 : vector<32x1xf32> to vector<32x128xf32>
    %35 = arith.addf %32, %34 : vector<32x128xf32>
    %cst_22 = arith.constant 0.000000e+00 : f32
    %36 = vector.broadcast %cst_22 : f32 to vector<32x128xf32>
    %37 = arith.maximumf %35, %36 : vector<32x128xf32>
    %c0_23 = arith.constant 0 : index
    %c0_24 = arith.constant 0 : index
    %c0_25 = arith.constant 0 : index
    %38 = vector.load %arg7[%c0_23, %c0_24, %c0_25] : memref<1x32x128xf32, #tpu.memory_space<vmem>>, vector<1x32x128xf32>
    %39 = vector.shape_cast %38 : vector<1x32x128xf32> to vector<32x128xf32>
    %40 = vector.shape_cast %37 : vector<32x128xf32> to vector<1x32x128xf32>
    tpu.vector_store %arg7[%c0_23, %c0_24, %c0_25], %40 {strides = array<i32>} : memref<1x32x128xf32, #tpu.memory_space<vmem>>, vector<1x32x128xf32>,
    return
  }
  func.func @transform_0(%arg0: i32, %arg1: i32) -> (i32, i32, i32) {
    %c0_i32 = arith.constant 0 : i32
    %c0_i32_0 = arith.constant 0 : i32
    return %arg0, %c0_i32, %arg1 : i32, i32, i32
  }
  func.func @transform_1(%arg0: i32, %arg1: i32) -> (i32, i32, i32, i32) {
    %c0_i32 = arith.constant 0 : i32
    %c0_i32_0 = arith.constant 0 : i32
    %c0_i32_1 = arith.constant 0 : i32
    return %arg0, %arg1, %c0_i32, %c0_i32_0 : i32, i32, i32, i32
  }
  func.func @transform_2(%arg0: i32, %arg1: i32) -> (i32, i32) {
    %c0_i32 = arith.constant 0 : i32
    %c0_i32_0 = arith.constant 0 : i32
    %c0_i32_1 = arith.constant 0 : i32
    return %c0_i32, %c0_i32_0 : i32, i32
  }
  func.func @transform_3(%arg0: i32, %arg1: i32) -> (i32, i32) {
    %c0_i32 = arith.constant 0 : i32
    %c0_i32_0 = arith.constant 0 : i32
    %c0_i32_1 = arith.constant 0 : i32
    return %c0_i32, %c0_i32_0 : i32, i32
  }
  func.func @transform_4(%arg0: i32, %arg1: i32) -> (i32, i32) {
    %c0_i32 = arith.constant 0 : i32
    %c0_i32_0 = arith.constant 0 : i32
    %c0_i32_1 = arith.constant 0 : i32
    return %c0_i32, %c0_i32_0 : i32, i32
  }
  func.func @transform_5(%arg0: i32, %arg1: i32) -> (i32, i32, i32) {
    %c0_i32 = arith.constant 0 : i32
    %c0_i32_0 = arith.constant 0 : i32
    return %arg0, %c0_i32, %arg1 : i32, i32, i32
  }
}

</mosaic_0001>

<bundles_post_ra>
// kernel: tpu_custom_call.1
= control target key start
LH: loop header
LB: loop body
LE: loop exit
PB: predicated region body
PF: predicated region fallthrough
CT: control target
= control target key end

     0   :  { %10 = vsyncpa [#allocation5], 0  ;;  %s1356_s0 = inlined_call_operand.vmem [shape: f32[2,24,256], index: 0, kind: input, shape index: {}]   ;;  %s1357_s1 = inlined_call_operand.vmem [shape: f32[2,2,24,8], index: 1, kind: input, shape index: {}]   ;;  %s1358_s2 = inlined_call_operand.vmem [shape: f32[24,5], index: 2, kind: input, shape index: {}]   ;;  %s1359_s3 = inlined_call_operand.vmem [shape: f32[32,24], index: 3, kind: input, shape index: {}]   ;;  %s1360_s4 = inlined_call_operand.vmem [shape: f32[32,1], index: 4, kind: input, shape index: {}]   ;;  %s1361_s5 = inlined_call_operand.hbm [shape: f32[2,32,256], index: 5, kind: output, shape index: {}]  }
   0x1   :  { %12 = vsyncpa [#allocation5 + $0x1], 0  ;;  %s1097_s18 = smov 0   ;;  %s1099_s19 = smov 0  }
   0x2   :  { %s1101_s20 = smov 0   ;;  %s1103_s21 = smov 0  }
   0x3   :  { %s1105_s22 = smov 0   ;;  %s1107_s23 = smov 0  }
   0x4   :  { %s1109_s24 = smov 0   ;;  %s1111_s25 = smov 0  }
   0x5 LB: > { %s813_s26 = sadd.s32 4294967295, %s1052_s25   ;;  %s814_s27 = sadd.s32 4294967294, %s1052_s25   ;;  %s1052_s25 = sphi %s1111_s25, %s18_s25   ;;  %s1048_s24 = sphi %s1109_s24, %s1371_s24   ;;  %s1044_s23 = sphi %s1107_s23, %s1370_s23   ;;  %s1040_s22 = sphi %s1105_s22, %s1369_s22   ;;  %s1036_s21 = sphi %s1103_s21, %s1368_s21   ;;  %s1032_s20 = sphi %s1101_s20, %s1367_s20   ;;  %s1028_s19 = sphi %s1099_s19, %s1366_s19   ;;  %s1024_s18 = sphi %s1097_s18, %s1365_s18  }
   0x6   : > { %s27_s28 = sadd.s32 1, %s1044_s23  ;;  %s30_s29 = sadd.s32 1, %s1048_s24 }
   0x7   : > { %p28_p0 = scmp.ge.s32.totalorder %s27_s28, 2  ;;  %p46_p1 = scmp.ne.s32.totalorder %s1032_s20, %s1028_s19 }
   0x8   : > { %p47_p2 = scmp.eq.s32.totalorder %s1052_s25, 0  ;;  %p169_p5 = scmp.eq.s32.totalorder %s813_s26, 3 }
   0x9   : > { %s1373_s28 = smov (%p28_p0, %s27_s28), 0  ;;  %s1375_s29 = smov (!%p28_p0, %s30_s29), %s1048_s24 }
   0xa   : > { %s35_s30 = ssub.s32 %s1044_s23, %s1373_s28  ;;  %p1149_p3 = por %p47_p2, %p46_p1 }
   0xb   : > { %p32_p4 = scmp.ge.s32.totalorder %s1375_s29, 2  ;;  %p174_p6 = scmp.ne.s32.totalorder %s1028_s19, %s1024_s18 }
   0xc   : > { %p175_p7 = scmp.eq.s32.totalorder %s814_s27, 3  ;;  %p1157_p8 = por %p169_p5, %p46_p1 }
   0xd   : > { %s1377_s29 = smov (%p32_p4, %s1375_s29), 0  ;;  %s39_s11 = sadd.s32 1, %s1032_s20 }
   0xe   : > { %p1161_p9 = por %p175_p7, %p174_p6  ;;  %s34_s9 = ssub.s32 %s1048_s24, %s1377_s29 }
   0xf   : > { %s36_s10 = sor.u32 %s35_s30, %s34_s9  ;;  %p816_p11 = scmp.ge.s32.totalorder %s1052_s25, 4 }
  0x10   : > { %p37_p10 = scmp.eq.s32.totalorder %s36_s10, 0 }
  0x11   : > { %200 = sbr.rel (%p816_p11) target bundleno = 33 (0x21), region = 28 }
  0x12   : > { %s1169_s12 = scalar_select %p37_p10, %s1032_s20, %s39_s11  }
  0x18   : > { %203 = sbr.rel (!%p1149_p3) target bundleno = 33 (0x21), region = 32  ;;  %s205_s13 = sand.u32 (%p1149_p3), 1, %s1032_s20  }
  0x19   : > { %s858_s14 = smul.u32 (%p1149_p3), 6, %s1048_s24 }
  0x1a   : > { %s857_s15 = smul.u32 (%p1149_p3), 24, %s205_s13 }
  0x1b   : > { %s209_s16 = sadd.s32 (%p1149_p3), %s1044_s23, %s858_s14 }
  0x1c   : > { %s817_s17 = sshll.u32 (%p1149_p3), %s209_s16, 3  ;;  %s207_s9 = scalar_lea.vmem (%p1149_p3), [#allocation3], %s857_s15 }
  0x1d   : > { %s211_s30 = scalar_lea.vmem (%p1149_p3), %s1356_s0, %s817_s17 }
  0x1e   : > { %v243_v0 = vld [vmem:[%s211_s30] sm:$0xff] (%p1149_p3)  ;;  %v245_v1 = vld [vmem:[%s211_s30 + $0x10] sm:$0xff] (%p1149_p3) }
  0x1f   : > { %v247_v2 = vld [vmem:[%s211_s30 + $0x20] sm:$0xff]  ;;  %244 = vst [vmem:[%s207_s9] sm:$0xff] %v243_v0  ;;  %246 = vst [vmem:[%s207_s9 + $0x8] sm:$0xff] %v245_v1 }
  0x20   : > { %248 = vst [vmem:[%s207_s9 + $0x10] sm:$0xff] %v247_v2 }
  0x21 PF: > { %p818_p12 = scmp.ge.s32.totalorder %s1052_s25, 1  ;;  %p265_p13 = scmp.lt.s32.totalorder %s1052_s25, 5 }
  0x23   : > { %p266_p0 = pnand %p818_p12, %p265_p13 }
  0x24   : > { %v346_v3 = vld [vmem:[%s1358_s2] sm:$0xff] (!%p266_p0)  ;;  %s1186_s11 = sand.u32 (!%p266_p0), 1, %s1028_s19   ;;  %v1054_v4 = vmov (!%p266_p0), 1   ;;  %v1055_v5 = vmov (!%p266_p0), 2   ;;  %v347_v6 = vld [vmem:[%s1358_s2 + $0x8] sm:$0xff] (!%p266_p0)  ;;  %p308_p1 = scmp.lt.s32.totalorder (!%p266_p0), %s1040_s22, 1 }
  0x25   : > { %269 = sbr.rel (%p266_p0) target bundleno = 568 (0x238), region = 74  ;;  %945 = vset.pattern.permute.xlu1 (!%p266_p0), %v1054_v4  ;;  %946 = vset.pattern.permute.xlu0 (!%p266_p0), %v1055_v5  ;;  %s1056_s17 = smov (!%p266_p0), 8   ;;  %vm323_vm0 = vcmask (!%p266_p0), 64512   ;;  %v1057_v11 = vmov (!%p266_p0), 3   ;;  %v348_v14 = vld [vmem:[%s1358_s2 + $0x10] sm:$0xff] (!%p266_p0)  ;;  %v1058_v15 = vmov (!%p266_p0), 4  }
  0x26   : > { %s859_s13 = smul.u32 (!%p266_p0), 24, %s1186_s11  ;;  %377 = vperm.xlu1 (!%p266_p0), %945, %v346_v3   ;;  %p310_p2 = scmp.lt.s32.totalorder (!%p266_p0), %s1036_s21, 1  ;;  %v1059_v16 = vmov (!%p266_p0), 0   ;;  %vm339_vm1 = vcmask (!%p266_p0), 1047616   ;;  %v560_v56 = vld [vmem:[%s1359_s3] sm:$0xff] (!%p266_p0)  ;;  %vm588_vm2 = vcmask (!%p266_p0), 195584  }
  0x27   : > { %v562_v57 = vld [vmem:[%s1359_s3 + $0x10] sm:$0xff] (!%p266_p0)  ;;  %843 = vmatprep.mubr.msk.f32.mxu0 (!%p266_p0), %vm588_vm2, %v560_v56  ;;  %v565_v0 = vld [vmem:[%s1360_s4 + $0x8] sm:$0xff] (!%p266_p0)  ;;  %v564_v1 = vld [vmem:[%s1360_s4] sm:$0xff] (!%p266_p0)  ;;  %vm412_vm3 = vcmask (!%p266_p0), 1031168   ;;  %vm458_vm4 = vcmask (!%p266_p0), 1014784   ;;  %vm504_vm5 = vcmask (!%p266_p0), 998400  }
  0x28   : > { %s274_s16 = scalar_lea.vmem (!%p266_p0), [#allocation3], %s859_s13  ;;  %846 = vmatprep.mubr.msk.f32.mxu1 (!%p266_p0), %vm588_vm2, %v562_v57  ;;  %v567_v2 = vld [vmem:[%s1360_s4 + $0x18] sm:$0xff] (!%p266_p0)  ;;  %vm550_vm6 = vcmask (!%p266_p0), 982016  }
  0x29   : > { %v317_v7 = vld [vmem:[%s274_s16] sm:$0xff] (!%p266_p0)  ;;  %v318_v8 = vld [vmem:[%s274_s16 + $0x8] sm:$0xff] (!%p266_p0)  ;;  %v319_v12 = vld [vmem:[%s274_s16 + $0x10] sm:$0xff] (!%p266_p0)  ;;  %s1060_s16 = smov (!%p266_p0), 126  }
  0x2a   : > { %330 = vrot.lane.b32.xlu0 (!%p266_p0), %v317_v7, %s1056_s17  ;;  %381 = vperm.xlu1 (!%p266_p0), %945, %v347_v6  }
  0x2c   : > { %s309_s26 = scalar_select %p308_p1, %s1040_s22, 1 }
  0x2d   : > { %s311_s27 = scalar_select %p310_p2, %s1036_s21, 1 }
  0x2e   : > { %s861_s30 = smul.u32 6, %s309_s26  ;;  %332 = vrot.lane.b32.xlu0 %v318_v8, %s1056_s17  ;;  %947 = vset.pattern.permute.xlu1 %v1055_v5 }
  0x2f   : > { %s860_s9 = smul.u32 3, %s311_s27  ;;  %427 = vperm.xlu1 %947, %v347_v6   ;;  %s1064_s27 = smov [#allocation4]  }
  0x31   : > { %s314_s6 = sadd.s32 %s861_s30, %s860_s9  ;;  %s1061_s30 = smov 124  }
  0x32   : > { %s820_s10 = sshll.u32 %s314_s6, 3  ;;  %423 = vperm.xlu0 %946, %v346_v3   ;;  %s1062_s9 = smov 122  }
  0x33   : > { %s316_s15 = scalar_lea.vmem %s1357_s1, %s820_s10  ;;  %948 = vset.pattern.permute.xlu1 %v1057_v11  ;;  %s1063_s6 = smov 120  }
  0x34   : > { %v320_v9 = vld [vmem:[%s316_s15] sm:$0xff]  ;;  %v321_v10 = vld [vmem:[%s316_s15 + $0x8] sm:$0xff]  ;;  %469 = vperm.xlu1 %948, %v346_v3   ;;  %v322_v13 = vld [vmem:[%s316_s15 + $0x10] sm:$0xff]  ;;  %s826_s10 = sshll.u32 %s1040_s22, 3  ;;  %s695_s15 = scalar_lea.sflag [#allocation5], %s1186_s11 }
  0x35   : > { %324 = vst.msk [vmem:[#allocation2] sm:$0xff] %vm323_vm0, %v320_v9  ;;  %325 = vst.msk [vmem:[#allocation2 + $0x10] sm:$0xff] %vm323_vm0, %v321_v10 }
  0x36   : > { %949 = vset.pattern.permute.xlu0 %v1057_v11  ;;  %326 = vst.msk [vmem:[#allocation2 + $0x20] sm:$0xff] %vm323_vm0, %v322_v13 }
  0x37   : > { %473 = vperm.xlu0 %949, %v347_v6  }
  0x38   : > { %334 = vrot.lane.b32.xlu1 %v319_v12, %s1056_s17 }
  0x39   : > { %950 = vset.pattern.permute.xlu1 %v1054_v4 }
  0x3b   : > { %951 = vset.pattern.permute.xlu0 %v1058_v15 }
  0x3c   : > { %515 = vperm.xlu0 %951, %v346_v3   ;;  %385 = vperm.xlu1 %950, %v348_v14  }
  0x40   : > { %954 = vset.pattern.permute.xlu0 %v1057_v11  ;;  %952 = vset.pattern.permute.xlu1 %v1058_v15 }
  0x41   : > { %477 = vperm.xlu0 %954, %v348_v14   ;;  %519 = vperm.xlu1 %952, %v347_v6  }
  0x45   : > { %957 = vset.pattern.permute.xlu0 %v1059_v16  ;;  %953 = vset.pattern.permute.xlu1 %v1055_v5 }
  0x46   : > { %359 = vperm.xlu0 %957, %v347_v6   ;;  %431 = vperm.xlu1 %953, %v348_v14  }
  0x4a   : > { %955 = vset.pattern.permute.xlu1 %v1058_v15 }
  0x4b   : > { %523 = vperm.xlu1 %955, %v348_v14  }
  0x4f   : > { %956 = vset.pattern.permute.xlu1 %v1059_v16 }
  0x50   : > { %354 = vperm.xlu1 %956, %v346_v3   ;;  %v566_v3 = vld [vmem:[%s1360_s4 + $0x10] sm:$0xff] }
  0x54   : > { %364 = vperm.xlu1 %956, %v348_v14  }
  0x9c   : > { %v331_v17 = vpop.permute.xlu0 %330 }
  0x9d   : > { %340 = vst.msk [vmem:[#allocation2] sm:$0xff] %vm339_vm1, %v331_v17 }
  0x9e   : > { %341 = vst.msk [vmem:[#allocation2 + $0x8] sm:$0xff] %vm323_vm0, %v331_v17 }
  0xa0   : > { %v333_v18 = vpop.permute.xlu0 %332 }
  0xa1   : > { %342 = vst.msk [vmem:[#allocation2 + $0x10] sm:$0xff] %vm339_vm1, %v333_v18 }
  0xa2   : > { %343 = vst.msk [vmem:[#allocation2 + $0x18] sm:$0xff] %vm323_vm0, %v333_v18 }
  0xa4   : > { %v1212_v20 = vld [vmem:[#allocation2] sm:$0xff] }
  0xa5   : > { %v378_v19 = vpop.permute.xlu1 %377  ;;  %v371_v21 = vld [vmem:[#allocation2 + $0x8] sm:$0xff] }
  0xa6   : > { %v388_v22 = vmul.f32 %v378_v19, %v1212_v20  ;;  %v389_v23 = vmul.f32 %v378_v19, %v371_v21 }
  0xa8   : > { %402 = vrot.lane.b32.xlu0 %v389_v23, %s1060_s16  ;;  %400 = vrot.lane.b32.xlu1 %v388_v22, %s1060_s16  ;;  %v1217_v25 = vld [vmem:[#allocation2 + $0x10] sm:$0xff] }
  0xa9   : > { %v382_v24 = vpop.permute.xlu1 %381  ;;  %v373_v26 = vld [vmem:[#allocation2 + $0x18] sm:$0xff] }
  0xaa   : > { %v390_v27 = vmul.f32 %v382_v24, %v1217_v25  ;;  %v391_v28 = vmul.f32 %v382_v24, %v373_v26 }
  0xac   : > { %406 = vrot.lane.b32.xlu0 %v391_v28, %s1060_s16  ;;  %404 = vrot.lane.b32.xlu1 %v390_v27, %s1060_s16 }
  0xae   : > { %v428_v29 = vpop.permute.xlu1 %427 }
  0xaf   : > { %v436_v34 = vmul.f32 %v428_v29, %v1217_v25  ;;  %v437_v35 = vmul.f32 %v428_v29, %v373_v26 }
  0xb1   : > { %v424_v30 = vpop.permute.xlu0 %423 }
  0xb2   : > { %v434_v31 = vmul.f32 %v424_v30, %v1212_v20  ;;  %v435_v32 = vmul.f32 %v424_v30, %v371_v21 }
  0xb3   : > { %v470_v33 = vpop.permute.xlu1 %469 }
  0xb4   : > { %448 = vrot.lane.b32.xlu0 %v435_v32, %s1061_s30  ;;  %446 = vrot.lane.b32.xlu1 %v434_v31, %s1061_s30  ;;  %v480_v37 = vmul.f32 %v470_v33, %v1212_v20  ;;  %v481_v38 = vmul.f32 %v470_v33, %v371_v21 }
  0xb6   : > { %v474_v39 = vpop.permute.xlu0 %473 }
  0xb7   : > { %v335_v36 = vpop.permute.xlu1 %334  ;;  %v482_v40 = vmul.f32 %v474_v39, %v1217_v25  ;;  %v483_v41 = vmul.f32 %v474_v39, %v373_v26 }
  0xb8   : > { %452 = vrot.lane.b32.xlu0 %v437_v35, %s1061_s30  ;;  %450 = vrot.lane.b32.xlu1 %v436_v34, %s1061_s30  ;;  %344 = vst.msk [vmem:[#allocation2 + $0x20] sm:$0xff] %vm339_vm1, %v335_v36 }
  0xb9   : > { %345 = vst.msk [vmem:[#allocation2 + $0x28] sm:$0xff] %vm323_vm0, %v335_v36 }
  0xbb   : > { %v386_v42 = vpop.permute.xlu1 %385  ;;  %v516_v47 = vpop.permute.xlu0 %515 }
  0xbc   : > { %494 = vrot.lane.b32.xlu0 %v481_v38, %s1062_s9  ;;  %492 = vrot.lane.b32.xlu1 %v480_v37, %s1062_s9  ;;  %v526_v49 = vmul.f32 %v516_v47, %v1212_v20  ;;  %v527_v50 = vmul.f32 %v516_v47, %v371_v21 }
  0xbf   : > { %v1234_v43 = vld [vmem:[#allocation2 + $0x20] sm:$0xff] }
  0xc0   : > { %v375_v44 = vld [vmem:[#allocation2 + $0x28] sm:$0xff]  ;;  %498 = vrot.lane.b32.xlu0 %v483_v41, %s1062_s9  ;;  %496 = vrot.lane.b32.xlu1 %v482_v40, %s1062_s9  ;;  %v392_v45 = vmul.f32 %v386_v42, %v1234_v43  ;;  %v520_v48 = vpop.permute.xlu1 %519  ;;  %v478_v58 = vpop.permute.xlu0 %477 }
  0xc1   : > { %v393_v46 = vmul.f32 %v386_v42, %v375_v44  ;;  %v528_v51 = vmul.f32 %v520_v48, %v1217_v25  ;;  %v529_v52 = vmul.f32 %v520_v48, %v373_v26  ;;  %v484_v59 = vmul.f32 %v478_v58, %v1234_v43 }
  0xc2   : > { %v485_v60 = vmul.f32 %v478_v58, %v375_v44 }
  0xc4   : > { %410 = vrot.lane.b32.xlu0 %v393_v46, %s1060_s16  ;;  %408 = vrot.lane.b32.xlu1 %v392_v45, %s1060_s16  ;;  %s819_s16 = sshll.u32 %s1186_s11, 5 }
  0xc5   : > { %v432_v53 = vpop.permute.xlu1 %431  ;;  %v360_v5 = vpop.permute.xlu0 %359  ;;  %s307_s13 = scalar_lea.vmem [#allocation4], %s819_s16  ;;  %s962_s16 = sshll.u32 %s1064_s27, 4  ;;  %s963_s16 = int_to_ptr.vmem [resolvable:$false] %s962_s16 }
  0xc6   : > { %v438_v54 = vmul.f32 %v432_v53, %v1234_v43  ;;  %v439_v55 = vmul.f32 %v432_v53, %v375_v44  ;;  %v368_v24 = vmul.f32 %v1217_v25, %v360_v5 }
  0xc8   : > { %540 = vrot.lane.b32.xlu0 %v527_v50, %s1063_s6  ;;  %538 = vrot.lane.b32.xlu1 %v526_v49, %s1063_s6 }
  0xca   : > { %v524_v61 = vpop.permute.xlu1 %523 }
  0xcb   : > { %v530_v62 = vmul.f32 %v524_v61, %v1234_v43  ;;  %v531_v63 = vmul.f32 %v524_v61, %v375_v44 }
  0xcc   : > { %544 = vrot.lane.b32.xlu0 %v529_v52, %s1063_s6  ;;  %542 = vrot.lane.b32.xlu1 %v528_v51, %s1063_s6 }
  0xcf   : > { %v355_v4 = vpop.permute.xlu1 %354 }
  0xd0   : > { %456 = vrot.lane.b32.xlu0 %v439_v55, %s1061_s30  ;;  %454 = vrot.lane.b32.xlu1 %v438_v54, %s1061_s30  ;;  %v367_v26 = vmul.f32 %v1212_v20, %v355_v4  ;;  %s706_s30 = sadd.s32 %s1036_s21, %s826_s10  ;;  %s964_s10 = scalar_lea.vmem %s963_s16, 1024 }
  0xd1   : > { %s827_s14 = sshll.u32 %s706_s30, 7 }
  0xd3   : > { %v365_v6 = vpop.permute.xlu1 %364 }
  0xd4   : > { %502 = vrot.lane.b32.xlu0 %v485_v60, %s1062_s9  ;;  %500 = vrot.lane.b32.xlu1 %v484_v59, %s1062_s9  ;;  %v369_v48 = vmul.f32 %v1234_v43, %v365_v6  ;;  %v561_v59 = vld [vmem:[%s1359_s3 + $0x8] sm:$0xff]  ;;  %v563_v60 = vld [vmem:[%s1359_s3 + $0x18] sm:$0xff]  ;;  %s709_s9 = sshll.u32 %s307_s13, 4  ;;  %s1296_s9 = int_to_ptr.vmem [resolvable:$true] %s709_s9 }
  0xd5   : > { %s958_s26 = scalar_lea.vmem %s1296_s9, 512  ;;  %p965_p6 = scmp.lt.s32.totalorder %s1296_s9, %s963_s16 }
  0xd6   : > { %p959_p3 = scmp.ne.s32.totalorder %s1296_s9, %s958_s26  ;;  %p966_p7 = scmp.lt.s32.totalorder %s964_s10, %s958_s26 }
  0xd8   : > { %548 = vrot.lane.b32.xlu0 %v531_v63, %s1063_s6  ;;  %546 = vrot.lane.b32.xlu1 %v530_v62, %s1063_s6  ;;  %s1301_s6 = scalar_lea.hbm %s1361_s5, %s827_s14  ;;  %p960_p4 = pnand %p959_p3, %p1157_p8 }
  0xd9   : > { %p967_p10 = por %p966_p7, %p965_p6 }
  0xda   : > { %p961_p5 = pneg %p960_p4 }
  0xdc   : > { %575 = vperm.xlu0 %957, %v565_v0   ;;  %570 = vperm.xlu1 %956, %v564_v1   ;;  %p968_p11 = pnand %p967_p10, %p961_p5 }
  0xe0   : > { %585 = vperm.xlu0 %957, %v567_v2   ;;  %580 = vperm.xlu1 %956, %v566_v3  }
 0x11a   : > { %v401_v7 = vpop.permute.xlu1 %400  ;;  %v403_v8 = vpop.permute.xlu0 %402 }
 0x11b   : > { %v413_v22 = vsel %vm412_vm3, %v401_v7, %v403_v8 }
 0x11c   : > { %v419_v29 = vadd.f32 %v413_v22, %v367_v26 }
 0x11e   : > { %v405_v9 = vpop.permute.xlu1 %404  ;;  %v407_v10 = vpop.permute.xlu0 %406 }
 0x11f   : > { %v414_v23 = vsel %vm412_vm3, %v405_v9, %v407_v10 }
 0x120   : > { %v420_v30 = vadd.f32 %v414_v23, %v368_v24 }
 0x126   : > { %v447_v11 = vpop.permute.xlu1 %446  ;;  %v449_v12 = vpop.permute.xlu0 %448 }
 0x127   : > { %v459_v27 = vsel %vm458_vm4, %v447_v11, %v449_v12 }
 0x128   : > { %v465_v35 = vadd.f32 %v459_v27, %v419_v29 }
 0x12a   : > { %v451_v13 = vpop.permute.xlu1 %450  ;;  %v453_v14 = vpop.permute.xlu0 %452 }
 0x12b   : > { %v460_v28 = vsel %vm458_vm4, %v451_v13, %v453_v14 }
 0x12c   : > { %v466_v36 = vadd.f32 %v460_v28, %v420_v30 }
 0x12e   : > { %v493_v15 = vpop.permute.xlu1 %492  ;;  %v495_v16 = vpop.permute.xlu0 %494 }
 0x12f   : > { %v505_v33 = vsel %vm504_vm5, %v493_v15, %v495_v16 }
 0x130   : > { %v511_v37 = vadd.f32 %v505_v33, %v465_v35 }
 0x132   : > { %v497_v17 = vpop.permute.xlu1 %496  ;;  %v499_v18 = vpop.permute.xlu0 %498 }
 0x133   : > { %v506_v34 = vsel %vm504_vm5, %v497_v17, %v499_v18 }
 0x134   : > { %v512_v20 = vadd.f32 %v506_v34, %v466_v36 }
 0x136   : > { %v409_v19 = vpop.permute.xlu1 %408  ;;  %v411_v21 = vpop.permute.xlu0 %410 }
 0x137   : > { %v415_v47 = vsel %vm412_vm3, %v409_v19, %v411_v21 }
 0x138   : > { %v421_v50 = vadd.f32 %v415_v47, %v369_v48 }
 0x13a   : > { %v539_v31 = vpop.permute.xlu1 %538  ;;  %v541_v32 = vpop.permute.xlu0 %540 }
 0x13b   : > { %v551_v25 = vsel %vm550_vm6, %v539_v31, %v541_v32 }
 0x13c   : > { %v557_v41 = vadd.f32 %v551_v25, %v511_v37 }
 0x13e   : > { %v543_v38 = vpop.permute.xlu1 %542  ;;  %v545_v39 = vpop.permute.xlu0 %544 }
 0x13f   : > { %v552_v40 = vsel %vm550_vm6, %v543_v38, %v545_v39 }
 0x140   : > { %v558_v42 = vadd.f32 %v552_v40, %v512_v20 }
 0x142   : > { %v849_v44 = vpack.c.bf16 %v558_v42, %v557_v41  ;;  %v455_v45 = vpop.permute.xlu1 %454  ;;  %v457_v46 = vpop.permute.xlu0 %456 }
 0x143   : > { %v461_v49 = vsel %vm458_vm4, %v455_v45, %v457_v46 }
 0x144   : > { %850 = vmatprep.subr.bf16.mxu0 %v849_v44  ;;  %853 = vmatprep.subr.bf16.mxu1 %v849_v44  ;;  %v467_v54 = vadd.f32 %v461_v49, %v421_v50 }
 0x145   : > { %852 = vmatpush3.bf16.msra.mxu0 %v849_v44  ;;  %855 = vmatpush3.bf16.msra.mxu1 %v849_v44 }
 0x146   : > { %v501_v51 = vpop.permute.xlu1 %500  ;;  %v503_v52 = vpop.permute.xlu0 %502 }
 0x147   : > { %v507_v53 = vsel %vm504_vm5, %v501_v51, %v503_v52 }
 0x148   : > { %v513_v55 = vadd.f32 %v507_v53, %v467_v54 }
 0x14a   : > { %v547_v56 = vpop.permute.xlu1 %546  ;;  %v549_v57 = vpop.permute.xlu0 %548 }
 0x14b   : > { %v553_v43 = vsel %vm550_vm6, %v547_v56, %v549_v57 }
 0x14c   : > { %v559_v58 = vadd.f32 %v553_v43, %v513_v55 }
 0x14e   : > { %841 = vmatprep.subr.mxu0 %v559_v58  ;;  %854 = vmatprep.subr.mxu1 %v559_v58 }
 0x14f   : > { %842 = vmatpush3.msra.mxu0 %v559_v58  ;;  %856 = vmatpush3.msra.mxu1 %v559_v58 }
 0x150   : > { %844 = vmatmul.mubr.msk.f32.vlgmr.msra.gmra.mrb[0].mxu0 %vm588_vm2, %v561_v59  ;;  %847 = vmatmul.mubr.msk.f32.vlgmr.msra.gmra.mrb[0].mxu1 %vm588_vm2, %v563_v60 }
 0x15b   : > { %v571_v61 = vpop.permute.xlu1 %570  ;;  %v576_v62 = vpop.permute.xlu0 %575 }
 0x15f   : > { %v581_v63 = vpop.permute.xlu1 %580  ;;  %v586_v0 = vpop.permute.xlu0 %585 }
 0x223   : > { %v845_v1 = vpop.f32.mrb[0].mxu0  ;;  %v848_v2 = vpop.f32.mrb[0].mxu1 }
 0x224   : > { %v673_v3 = vadd.f32 %v845_v1, %v576_v62  ;;  %v683_v4 = vadd.f32 %v848_v2, %v586_v0  ;;  %v667_v5 = vpop.f32.mrb[1].mxu0  ;;  %v677_v6 = vpop.f32.mrb[1].mxu1 }
 0x225   : > { %v668_v7 = vadd.f32 %v667_v5, %v571_v61  ;;  %v678_v8 = vadd.f32 %v677_v6, %v581_v63 }
 0x226   : > { %v687_v9 = vmax.f32 %v673_v3, 0.0  ;;  %v689_v10 = vmax.f32 %v683_v4, 0.0 }
 0x227   : > { %v686_v11 = vmax.f32 %v668_v7, 0.0  ;;  %v688_v12 = vmax.f32 %v678_v8, 0.0 }
 0x228   : > { %691 = vst [vmem:[%s307_s13 + $0x8] sm:$0xff] %v687_v9  ;;  %693 = vst [vmem:[%s307_s13 + $0x18] sm:$0xff] %v689_v10 }
 0x229   : > { %690 = vst [vmem:[%s307_s13] sm:$0xff] %v686_v11  ;;  %692 = vst [vmem:[%s307_s13 + $0x10] sm:$0xff] %v688_v12 }
 0x22a   : > { %971 = shalt.err (!%p968_p11)
}
 0x22b   : > { %s972_s30 = scalar_lea.hbm %s1301_s6, 512  ;;  %s976_s21 = scalar_lea.hbm %s1361_s5, 2048 }
 0x22c   : > { %p973_p12 = scmp.ne.s32.totalorder %s1301_s6, %s972_s30  ;;  %p977_p1 = scmp.lt.u32.totalorder %s1301_s6, %s1361_s5 }
 0x22d   : > { %p978_p2 = scmp.lt.u32.totalorder %s976_s21, %s972_s30  ;;  %p980_p4 = scmp.lt.u32.totalorder %s972_s30, %s1301_s6 }
 0x22e   : > { %p974_p13 = pnand %p973_p12, %p1157_p8 }
 0x22f   : > { %p979_p3 = por %p978_p2, %p977_p1 }
 0x230   : > { %p975_p0 = pneg %p974_p13 }
 0x231   : > { %p981_p5 = por %p980_p4, %p979_p3 }
 0x233   : > { %p982_p6 = pnand %p981_p5, %p975_p0 }
 0x235   : > { %985 = shalt.err (!%p982_p6)
}
 0x236   : > { %s1065_s26 = smov 128   ;;  %s1066_s16 = smov 256  }
 0x237   : > { %862 = dma.vmem_to_hbm [thread:$0]  (%p1157_p8), %s1296_s9, 512, %s1301_s6, %s695_s15, %s1065_s26, %s1066_s16, %s1056_s17  }
 0x238 PF: > { %p868_p7 = scmp.ge.s32.totalorder %s1052_s25, 2  ;;  %s724_s10 = sand.u32 1, %s1024_s18  }
 0x239   : > { %s725_s30 = scalar_lea.sflag [#allocation5], %s724_s10 }
 0x23a   : > { %p865_p10 = pnand %p868_p7, %p1161_p9 }
 0x23c   : > { %1019 = dma.done.wait (!%p865_p10), %s725_s30, 512  }
 0x23d   : > { %1021 = vsyncadd (!%p865_p10), %s725_s30, 4294966784  ;;  %s18_s25 = sadd.s32 1, %s1052_s25   ;;  %s1365_s18 = smov %s1028_s19 }
 0x23e   : > { %p15_p11 = scmp.ge.s32.totalorder %s18_s25, 6   ;;  %s1366_s19 = smov %s1032_s20 }
 0x23f   : > { %s1367_s20 = smov %s1169_s12  ;;  %s1368_s21 = smov %s1044_s23 }
 0x240   : > { %s1369_s22 = smov %s1048_s24  ;;  %s1370_s23 = smov %s1373_s28 }
 0x241   : > { %s1371_s24 = smov %s1377_s29  ;;  %17 = sbr.rel (!%p15_p11) target bundleno = 5 (0x5), region = 121 }
 0x248   :  { %730 = vsyncpa [#allocation5], 1 }
 0x249   :  { %732 = vsyncpa [#allocation5 + $0x1], 1 }

</bundles_post_ra>
